<compile_context>
chip_gen: v5e
topology: v5e:2x2
jax: 0.10.0
libtpu: 0.0.40
codegen_flags: <defaults>
</compile_context>

<pallas_src>
import jax
import jax.numpy as jnp
from jax.experimental import pallas as pl
from jax.experimental.pallas import tpu as pltpu

_LANE = 128


def _round_up(n, m):
    return ((n + m - 1) // m) * m


def mlp_wider_kernel(x_ref, w1_ref, b1_ref, w2_ref, b2_ref, o_ref):
    # x_ref : [TB, D_in]        bf16 batch tile
    # w1_ref: [D_in, H2p]       bf16 (resident across grid steps)
    # b1_ref: [1, H2p]          f32
    # w2_ref: [H2p, D_outp]     bf16 (resident across grid steps)
    # b2_ref: [1, D_outp]       f32
    # o_ref : [TB, D_outp]      f32, lane-dense (D_outp % 128 == 0)
    x = x_ref[...]
    # bf16 MXU inputs, f32 accumulation.
    h = jnp.dot(x, w1_ref[...], preferred_element_type=jnp.float32)
    h = jnp.maximum(h + b1_ref[...], 0.0)            # bias + ReLU in f32
    h = h.astype(w2_ref.dtype)                       # bf16 for second MXU pass
    out = jnp.dot(h, w2_ref[...], preferred_element_type=jnp.float32)
    o_ref[...] = (out + b2_ref[...]).astype(o_ref.dtype)


def prepare_params(w1, b1, w2, b2):
    """One-time relayout of PyTorch nn.Linear parameters for the kernel.

    w1: [H2, D_in], b1: [H2], w2: [D_out, H2], b2: [D_out]  (PyTorch layout)
    Returns weights transposed to (in, out), zero-padded to lane-dense
    (multiples of 128) widths, bf16 weights / f32 biases.
    """
    h2, d_in = w1.shape
    d_out = w2.shape[0]
    h2p = _round_up(h2, _LANE)
    d_outp = _round_up(d_out, _LANE)

    w1_t = jnp.zeros((d_in, h2p), jnp.bfloat16)
    w1_t = w1_t.at[:, :h2].set(w1.T.astype(jnp.bfloat16))
    b1_p = jnp.zeros((1, h2p), jnp.float32).at[:, :h2].set(b1.astype(jnp.float32))

    w2_t = jnp.zeros((h2p, d_outp), jnp.bfloat16)
    w2_t = w2_t.at[:h2, :d_out].set(w2.T.astype(jnp.bfloat16))
    b2_p = jnp.zeros((1, d_outp), jnp.float32).at[:, :d_out].set(b2.astype(jnp.float32))

    return (w1_t, b1_p, w2_t, b2_p, d_out)


def mlp_wider_forward(x_nchw, params, *, batch_tile=1024):
    """x_nchw: [B, C, H, W].  params: output of prepare_params()."""
    w1_t, b1_p, w2_t, b2_p, d_out = params
    B = x_nchw.shape[0]
    d_in = x_nchw.shape[1] * x_nchw.shape[-2] * x_nchw.shape[-1]
    # == x.view(-1, C*H*W); cast to bf16 halves the activation DMA bytes.
    x_flat = x_nchw.reshape(B, d_in).astype(jnp.bfloat16)

    h2p = w1_t.shape[1]
    d_outp = w2_t.shape[1]

    tb = min(B, batch_tile)               # TB sized for v7x's 64 MiB VMEM
    grid = (pl.cdiv(B, tb),)

    out_padded = pl.pallas_call(
        mlp_wider_kernel,
        out_shape=jax.ShapeDtypeStruct((B, d_outp), jnp.float32),
        grid=grid,
        in_specs=[
            pl.BlockSpec((tb, d_in), lambda i: (i, 0)),    # batch-tiled input
            pl.BlockSpec((d_in, h2p), lambda i: (0, 0)),   # resident weights
            pl.BlockSpec((1, h2p), lambda i: (0, 0)),
            pl.BlockSpec((h2p, d_outp), lambda i: (0, 0)),
            pl.BlockSpec((1, d_outp), lambda i: (0, 0)),
        ],
        out_specs=pl.BlockSpec((tb, d_outp), lambda i: (i, 0)),
        compiler_params=pltpu.CompilerParams(
            dimension_semantics=("parallel",),             # megacore on v7x
            vmem_limit_bytes=32 * 1024 * 1024,             # safe on v5e/v6e/v7x
        ),
    )(x_flat, w1_t, b1_p, w2_t, b2_p)

    return out_padded[:, :d_out]


def init_params(key, dim_in, dim_hidden, dim_out, multi_ratio=2):
    """Deterministic init mimicking nn.Linear default (uniform +/- 1/sqrt(fan_in)),
    in the original PyTorch parameter layout."""
    h2 = dim_hidden * multi_ratio
    k1, k2, k3, k4 = jax.random.split(key, 4)
    bound1 = 1.0 / jnp.sqrt(dim_in)
    bound2 = 1.0 / jnp.sqrt(h2)
    w1 = jax.random.uniform(k1, (h2, dim_in), jnp.float32, -bound1, bound1)
    b1 = jax.random.uniform(k2, (h2,), jnp.float32, -bound1, bound1)
    w2 = jax.random.uniform(k3, (dim_out, h2), jnp.float32, -bound2, bound2)
    b2 = jax.random.uniform(k4, (dim_out,), jnp.float32, -bound2, bound2)
    return w1, b1, w2, b2


if __name__ == "__main__":
    # Small shapes: B=2, C=4, H=W=16 -> dim_in = 4*16*16 = 1024
    # (At B=2 the kernel is launch-overhead bound; the tiling/bf16/megacore
    #  wins only materialize at realistic batch sizes.)
    B, C, H, W = 2, 4, 16, 16
    dim_in = C * H * W
    dim_hidden = 32
    dim_out = 10

    key = jax.random.PRNGKey(0)
    kx, kp = jax.random.split(key)
    x = jax.random.normal(kx, (B, C, H, W), jnp.float32)
    w1, b1, w2, b2 = init_params(kp, dim_in, dim_hidden, dim_out, multi_ratio=2)

    params = prepare_params(w1, b1, w2, b2)      # one-time relayout (no per-call .T)
    out = mlp_wider_forward(x, params)
    jax.block_until_ready(out)

    # Reference check in plain f32 JAX (bf16 MXU inputs => loosened tolerance).
    x_flat = x.reshape(B, -1)
    ref = jnp.maximum(x_flat @ w1.T + b1, 0.0) @ w2.T + b2
    assert out.shape == (B, dim_out)
    assert jnp.allclose(out, ref, atol=5e-2, rtol=5e-2), (
        float(jnp.max(jnp.abs(out - ref))))

    print("KERNEL_OK")
</pallas_src>

<mosaic_0001>
module attributes {stable_mosaic.version = 11 : i64} {
  func.func @mlp_wider_kernel(%arg0: i32, %arg1: memref<2x1024xbf16, #tpu.memory_space<vmem>>, %arg2: memref<1024x128xbf16, #tpu.memory_space<vmem>>, %arg3: memref<1x128xf32, #tpu.memory_space<vmem>>, %arg4: memref<128x128xbf16, #tpu.memory_space<vmem>>, %arg5: memref<1x128xf32, #tpu.memory_space<vmem>>, %arg6: memref<2x128xf32, #tpu.memory_space<vmem>>) attributes {dimension_semantics = [#tpu.dimension_semantics<parallel>], iteration_bounds = array<i64: 1>, scalar_prefetch = 0 : i64, scratch_operands = 0 : i64, tpu.core_type = #tpu.core_type<tc>, window_params = [{transform_indices = @transform_0, window_bounds = array<i64: 2, 1024>}, {pipeline_mode = #tpu.pipeline_mode<synchronous>, transform_indices = @transform_1, window_bounds = array<i64: 1024, 128>}, {pipeline_mode = #tpu.pipeline_mode<synchronous>, transform_indices = @transform_2, window_bounds = array<i64: 1, 128>}, {pipeline_mode = #tpu.pipeline_mode<synchronous>, transform_indices = @transform_3, window_bounds = array<i64: 128, 128>}, {pipeline_mode = #tpu.pipeline_mode<synchronous>, transform_indices = @transform_4, window_bounds = array<i64: 1, 128>}, {transform_indices = @transform_5, window_bounds = array<i64: 2, 128>}]} {
    %c0 = arith.constant 0 : index
    %c0_0 = arith.constant 0 : index
    %0 = vector.load %arg1[%c0, %c0_0] : memref<2x1024xbf16, #tpu.memory_space<vmem>>, vector<2x1024xbf16>
    %c0_1 = arith.constant 0 : index
    %c0_2 = arith.constant 0 : index
    %1 = vector.load %arg2[%c0_1, %c0_2] : memref<1024x128xbf16, #tpu.memory_space<vmem>>, vector<1024x128xbf16>
    %cst = arith.constant dense<0.000000e+00> : vector<2x128xf32>
    %2 = tpu.matmul %0, %1, %cst {dimension_numbers = #tpu.dot_dimension_numbers<[1], [0], [0], [1], [0, 0, 1, 1], [], []>} : vector<2x1024xbf16>, vector<1024x128xbf16>, vector<2x128xf32> -> vector<2x128xf32>
    %c0_3 = arith.constant 0 : index
    %c0_4 = arith.constant 0 : index
    %3 = vector.load %arg3[%c0_3, %c0_4] : memref<1x128xf32, #tpu.memory_space<vmem>>, vector<1x128xf32>
    %4 = vector.broadcast %3 : vector<1x128xf32> to vector<2x128xf32>
    %5 = arith.addf %2, %4 : vector<2x128xf32>
    %cst_5 = arith.constant 0.000000e+00 : f32
    %6 = vector.broadcast %cst_5 : f32 to vector<2x128xf32>
    %7 = arith.maximumf %5, %6 : vector<2x128xf32>
    %8 = arith.truncf %7 : vector<2x128xf32> to vector<2x128xbf16>
    %c0_6 = arith.constant 0 : index
    %c0_7 = arith.constant 0 : index
    %9 = vector.load %arg4[%c0_6, %c0_7] : memref<128x128xbf16, #tpu.memory_space<vmem>>, vector<128x128xbf16>
    %cst_8 = arith.constant dense<0.000000e+00> : vector<2x128xf32>
    %10 = tpu.matmul %8, %9, %cst_8 {dimension_numbers = #tpu.dot_dimension_numbers<[1], [0], [0], [1], [0, 0, 1, 1], [], []>} : vector<2x128xbf16>, vector<128x128xbf16>, vector<2x128xf32> -> vector<2x128xf32>
    %c0_9 = arith.constant 0 : index
    %c0_10 = arith.constant 0 : index
    %11 = vector.load %arg5[%c0_9, %c0_10] : memref<1x128xf32, #tpu.memory_space<vmem>>, vector<1x128xf32>
    %12 = vector.broadcast %11 : vector<1x128xf32> to vector<2x128xf32>
    %13 = arith.addf %10, %12 : vector<2x128xf32>
    %c0_11 = arith.constant 0 : index
    %c0_12 = arith.constant 0 : index
    %14 = vector.load %arg6[%c0_11, %c0_12] : memref<2x128xf32, #tpu.memory_space<vmem>>, vector<2x128xf32>
    tpu.vector_store %arg6[%c0_11, %c0_12], %13 {strides = array<i32>} : memref<2x128xf32, #tpu.memory_space<vmem>>, vector<2x128xf32>,
    return
  }
  func.func @transform_0(%arg0: i32) -> (i32, i32) {
    %c0_i32 = arith.constant 0 : i32
    %c0_i32_0 = arith.constant 0 : i32
    return %arg0, %c0_i32 : i32, i32
  }
  func.func @transform_1(%arg0: i32) -> (i32, i32) {
    %c0_i32 = arith.constant 0 : i32
    %c0_i32_0 = arith.constant 0 : i32
    %c0_i32_1 = arith.constant 0 : i32
    return %c0_i32, %c0_i32_0 : i32, i32
  }
  func.func @transform_2(%arg0: i32) -> (i32, i32) {
    %c0_i32 = arith.constant 0 : i32
    %c0_i32_0 = arith.constant 0 : i32
    %c0_i32_1 = arith.constant 0 : i32
    return %c0_i32, %c0_i32_0 : i32, i32
  }
  func.func @transform_3(%arg0: i32) -> (i32, i32) {
    %c0_i32 = arith.constant 0 : i32
    %c0_i32_0 = arith.constant 0 : i32
    %c0_i32_1 = arith.constant 0 : i32
    return %c0_i32, %c0_i32_0 : i32, i32
  }
  func.func @transform_4(%arg0: i32) -> (i32, i32) {
    %c0_i32 = arith.constant 0 : i32
    %c0_i32_0 = arith.constant 0 : i32
    %c0_i32_1 = arith.constant 0 : i32
    return %c0_i32, %c0_i32_0 : i32, i32
  }
  func.func @transform_5(%arg0: i32) -> (i32, i32) {
    %c0_i32 = arith.constant 0 : i32
    %c0_i32_0 = arith.constant 0 : i32
    return %arg0, %c0_i32 : i32, i32
  }
}

</mosaic_0001>

<bundles_post_ra>
// kernel: tpu_custom_call.1
= control target key start
LH: loop header
LB: loop body
LE: loop exit
PB: predicated region body
PF: predicated region fallthrough
CT: control target
= control target key end

     0   :  { %10 = vsyncpa [#allocation3], 0  ;;  %s1331_s0 = inlined_call_operand.hbm [shape: bf16[2,1024], index: 0, kind: input, shape index: {}]   ;;  %s1332_s1 = inlined_call_operand.hbm [shape: bf16[1024,128], index: 1, kind: input, shape index: {}]   ;;  %s1333_s2 = inlined_call_operand.vmem [shape: f32[1,128], index: 2, kind: input, shape index: {}]   ;;  %s1334_s3 = inlined_call_operand.hbm [shape: bf16[128,128], index: 3, kind: input, shape index: {}]   ;;  %s1335_s4 = inlined_call_operand.vmem [shape: f32[1,128], index: 4, kind: input, shape index: {}]   ;;  %s1336_s5 = inlined_call_operand.hbm [shape: f32[2,128], index: 5, kind: output, shape index: {}]  }
   0x1   :  { %11 = vsyncpa [#allocation6], 0  ;;  %s28_s20 = sshll.u32 %s1332_s1, 4  ;;  %s29_s20 = int_to_ptr.hbm [resolvable:$true] %s28_s20 }
   0x2   :  { %12 = vsyncpa [#allocation4], 0  ;;  %s1277_s21 = smov [#allocation5]   ;;  %s18_s25 = sshll.u32 %s1331_s0, 4  ;;  %s19_s25 = int_to_ptr.hbm [resolvable:$true] %s18_s25 }
   0x3   :  { %s30_s22 = sshll.u32 %s1277_s21, 4  ;;  %s1278_s26 = smov 64   ;;  %s31_s22 = int_to_ptr.vmem [resolvable:$true] %s30_s22 }
   0x4   :  { %s1279_s27 = smov 4   ;;  %s1280_s28 = smov [#allocation2]  }
   0x5   :  { %36 = dma.hbm_to_vmem [thread:$0]  %s29_s20, 8192, %s31_s22, [#allocation6], %s1278_s26, %s1278_s26, %s1279_s27  }
   0x6   :  { %s20_s29 = sshll.u32 %s1280_s28, 4  ;;  %s43_s7 = sshll.u32 %s1334_s3, 4  ;;  %s21_s29 = int_to_ptr.vmem [resolvable:$true] %s20_s29  ;;  %s44_s7 = int_to_ptr.hbm [resolvable:$true] %s43_s7 }
   0x7   :  { %23 = dma.hbm_to_vmem [thread:$0]  %s19_s25, 128, %s21_s29, [#allocation3]  }
   0x8   :  { %s1281_s1 = smov [#allocation7]  }
   0x9   :  { %s45_s8 = sshll.u32 %s1281_s1, 4  ;;  %s46_s8 = int_to_ptr.vmem [resolvable:$true] %s45_s8 }
   0xa   :  { %51 = dma.hbm_to_vmem [thread:$0]  %s44_s7, 1024, %s46_s8, [#allocation6], %s1278_s26, %s1278_s26, %s1279_s27  }
   0xb   :  { %1271 = dma.done.wait [#allocation3], 128  }
   0xc   :  { %1272 = vsyncadd [#allocation3], 4294967168 }
   0xd   :  { %1273 = dma.done.wait [#allocation6], 9216  }
   0xe   :  { %1274 = vsyncadd [#allocation6], 4294958080  ;;  %v1102_v0 = vld [vmem:[#allocation5 + $0x38] sm:$0xff]  ;;  %v1101_v4 = vld [vmem:[#allocation5 + $0x30] sm:$0xff]  ;;  %s1282_s10 = smov [#allocation8]   ;;  %s796_s14 = sshll.u32 %s1336_s5, 4  ;;  %s797_s14 = int_to_ptr.hbm [resolvable:$true] %s796_s14 }
   0xf   :  { %v1110_v1 = vld [vmem:[#allocation5 + $0x78] sm:$0xff]  ;;  %601 = vmatpush.bf16.msra.mxu0 %v1102_v0  ;;  %v1109_v5 = vld [vmem:[#allocation5 + $0x70] sm:$0xff]  ;;  %v1100_v8 = vld [vmem:[#allocation5 + $0x28] sm:$0xff]  ;;  %s794_s11 = sshll.u32 %s1282_s10, 4  ;;  %s795_s11 = int_to_ptr.vmem [resolvable:$true] %s794_s11 }
  0x10   :  { %v1118_v2 = vld [vmem:[#allocation5 + $0xb8] sm:$0xff]  ;;  %614 = vmatpush.bf16.msra.mxu1 %v1110_v1  ;;  %v1117_v6 = vld [vmem:[#allocation5 + $0xb0] sm:$0xff]  ;;  %v1108_v9 = vld [vmem:[#allocation5 + $0x68] sm:$0xff] }
  0x11   :  { %v1126_v3 = vld [vmem:[#allocation5 + $0xf8] sm:$0xff]  ;;  %627 = vmatpush.bf16.msra.mxu2 %v1118_v2  ;;  %v1125_v7 = vld [vmem:[#allocation5 + $0xf0] sm:$0xff]  ;;  %v1116_v10 = vld [vmem:[#allocation5 + $0xa8] sm:$0xff] }
  0x12   :  { %640 = vmatpush.bf16.msra.mxu3 %v1126_v3  ;;  %v1124_v11 = vld [vmem:[#allocation5 + $0xe8] sm:$0xff]  ;;  %v1099_v12 = vld [vmem:[#allocation5 + $0x20] sm:$0xff]  ;;  %v66_v16 = vld [vmem:[#allocation2] sm:$0xff] }
  0x13   :  { %602 = vmatpush.bf16.msra.mxu0 %v1101_v4  ;;  %v1107_v13 = vld [vmem:[#allocation5 + $0x60] sm:$0xff]  ;;  %v1098_v17 = vld [vmem:[#allocation5 + $0x18] sm:$0xff]  ;;  %200 = vst [vmem:[#allocation1] ss:$9 sm:$0xff] %v66_v16  ;;  %v1097_v21 = vld [vmem:[#allocation5 + $0x10] sm:$0xff] }
  0x14   :  { %615 = vmatpush.bf16.msra.mxu1 %v1109_v5  ;;  %v1115_v14 = vld [vmem:[#allocation5 + $0xa0] sm:$0xff]  ;;  %v1106_v18 = vld [vmem:[#allocation5 + $0x58] sm:$0xff]  ;;  %v1105_v22 = vld [vmem:[#allocation5 + $0x50] sm:$0xff] }
  0x15   :  { %628 = vmatpush.bf16.msra.mxu2 %v1117_v6  ;;  %v1123_v15 = vld [vmem:[#allocation5 + $0xe0] sm:$0xff]  ;;  %v1114_v19 = vld [vmem:[#allocation5 + $0x98] sm:$0xff]  ;;  %v1113_v23 = vld [vmem:[#allocation5 + $0x90] sm:$0xff] }
  0x16   :  { %641 = vmatpush.bf16.msra.mxu3 %v1125_v7  ;;  %v1122_v20 = vld [vmem:[#allocation5 + $0xd8] sm:$0xff]  ;;  %v1121_v24 = vld [vmem:[#allocation5 + $0xd0] sm:$0xff]  ;;  %v1096_v25 = vld [vmem:[#allocation5 + $0x8] sm:$0xff] }
  0x17   :  { %603 = vmatpush.bf16.msra.mxu0 %v1100_v8  ;;  %v1104_v26 = vld [vmem:[#allocation5 + $0x48] sm:$0xff]  ;;  %v1095_v29 = vld [vmem:[#allocation5] sm:$0xff]  ;;  %v1134_v33 = vld [vmem:[#allocation5 + $0x138] sm:$0xff] }
  0x18   :  { %616 = vmatpush.bf16.msra.mxu1 %v1108_v9  ;;  %v1112_v27 = vld [vmem:[#allocation5 + $0x88] sm:$0xff]  ;;  %v1103_v30 = vld [vmem:[#allocation5 + $0x40] sm:$0xff]  ;;  %v1142_v34 = vld [vmem:[#allocation5 + $0x178] sm:$0xff] }
  0x19   :  { %629 = vmatpush.bf16.msra.mxu2 %v1116_v10  ;;  %v1120_v28 = vld [vmem:[#allocation5 + $0xc8] sm:$0xff]  ;;  %v1111_v31 = vld [vmem:[#allocation5 + $0x80] sm:$0xff]  ;;  %v1150_v35 = vld [vmem:[#allocation5 + $0x1b8] sm:$0xff] }
  0x1a   :  { %642 = vmatpush.bf16.msra.mxu3 %v1124_v11  ;;  %v1119_v32 = vld [vmem:[#allocation5 + $0xc0] sm:$0xff]  ;;  %v1158_v36 = vld [vmem:[#allocation5 + $0x1f8] sm:$0xff]  ;;  %v1133_v37 = vld [vmem:[#allocation5 + $0x130] sm:$0xff] }
  0x1b   :  { %604 = vmatpush.bf16.msra.mxu0 %v1099_v12  ;;  %v203_v38 = vld [vmem:[#allocation1 + $0x12] sm:$0xff]  ;;  %v201_v39 = vld [vmem:[#allocation1] sm:$0xff]  ;;  %v202_v42 = vld [vmem:[#allocation1 + $0x9] sm:$0xff] }
  0x1c   :  { %617 = vmatpush.bf16.msra.mxu1 %v1107_v13  ;;  %v1141_v40 = vld [vmem:[#allocation5 + $0x170] sm:$0xff]  ;;  %v1132_v45 = vld [vmem:[#allocation5 + $0x128] sm:$0xff]  ;;  %v1131_v49 = vld [vmem:[#allocation5 + $0x120] sm:$0xff] }
  0x1d   :  { %630 = vmatpush.bf16.msra.mxu2 %v1115_v14  ;;  %v204_v41 = vld [vmem:[#allocation1 + $0x1b] sm:$0xff]  ;;  %v1139_v50 = vld [vmem:[#allocation5 + $0x160] sm:$0xff]  ;;  %v1130_v53 = vld [vmem:[#allocation5 + $0x118] sm:$0xff] }
  0x1e   :  { %643 = vmatpush.bf16.msra.mxu3 %v1123_v15  ;;  %v1149_v43 = vld [vmem:[#allocation5 + $0x1b0] sm:$0xff]  ;;  %v1140_v46 = vld [vmem:[#allocation5 + $0x168] sm:$0xff]  ;;  %v1147_v51 = vld [vmem:[#allocation5 + $0x1a0] sm:$0xff] }
  0x1f   :  { %605 = vmatpush.bf16.msra.mxu0 %v1098_v17  ;;  %v1157_v44 = vld [vmem:[#allocation5 + $0x1f0] sm:$0xff]  ;;  %v1148_v47 = vld [vmem:[#allocation5 + $0x1a8] sm:$0xff]  ;;  %v1155_v52 = vld [vmem:[#allocation5 + $0x1e0] sm:$0xff] }
  0x20   :  { %618 = vmatpush.bf16.msra.mxu1 %v1106_v18  ;;  %v1156_v48 = vld [vmem:[#allocation5 + $0x1e8] sm:$0xff]  ;;  %v1138_v54 = vld [vmem:[#allocation5 + $0x158] sm:$0xff]  ;;  %v1129_v57 = vld [vmem:[#allocation5 + $0x110] sm:$0xff] }
  0x21   :  { %631 = vmatpush.bf16.msra.mxu2 %v1114_v19  ;;  %v1146_v55 = vld [vmem:[#allocation5 + $0x198] sm:$0xff]  ;;  %v1137_v58 = vld [vmem:[#allocation5 + $0x150] sm:$0xff]  ;;  %v1128_v61 = vld [vmem:[#allocation5 + $0x108] sm:$0xff] }
  0x22   :  { %644 = vmatpush.bf16.msra.mxu3 %v1122_v20  ;;  %v1154_v56 = vld [vmem:[#allocation5 + $0x1d8] sm:$0xff]  ;;  %v1145_v59 = vld [vmem:[#allocation5 + $0x190] sm:$0xff]  ;;  %v1136_v62 = vld [vmem:[#allocation5 + $0x148] sm:$0xff] }
  0x23   :  { %606 = vmatpush.bf16.msra.mxu0 %v1097_v21  ;;  %v1153_v60 = vld [vmem:[#allocation5 + $0x1d0] sm:$0xff]  ;;  %v1144_v63 = vld [vmem:[#allocation5 + $0x188] sm:$0xff]  ;;  %v1127_v1 = vld [vmem:[#allocation5 + $0x100] sm:$0xff] }
  0x24   :  { %619 = vmatpush.bf16.msra.mxu1 %v1105_v22  ;;  %v1152_v0 = vld [vmem:[#allocation5 + $0x1c8] sm:$0xff]  ;;  %v1135_v2 = vld [vmem:[#allocation5 + $0x140] sm:$0xff]  ;;  %v205_v5 = vld [vmem:[#allocation1 + $0x24] sm:$0xff] }
  0x25   :  { %632 = vmatpush.bf16.msra.mxu2 %v1113_v23  ;;  %v1143_v3 = vld [vmem:[#allocation5 + $0x180] sm:$0xff]  ;;  %v208_v8 = vld [vmem:[#allocation1 + $0x3f] sm:$0xff]  ;;  %v1166_v9 = vld [vmem:[#allocation7 + $0x38] sm:$0xff] }
  0x26   :  { %645 = vmatpush.bf16.msra.mxu3 %v1121_v24  ;;  %v1151_v4 = vld [vmem:[#allocation5 + $0x1c0] sm:$0xff]  ;;  %v1165_v10 = vld [vmem:[#allocation7 + $0x30] sm:$0xff]  ;;  %v1164_v11 = vld [vmem:[#allocation7 + $0x28] sm:$0xff] }
  0x27   :  { %607 = vmatpush.bf16.msra.mxu0 %v1096_v25  ;;  %v206_v6 = vld [vmem:[#allocation1 + $0x2d] sm:$0xff]  ;;  %v207_v7 = vld [vmem:[#allocation1 + $0x36] sm:$0xff]  ;;  %v1161_v15 = vld [vmem:[#allocation7 + $0x10] sm:$0xff] }
  0x28   :  { %620 = vmatpush.bf16.msra.mxu1 %v1104_v26  ;;  %v1163_v12 = vld [vmem:[#allocation7 + $0x20] sm:$0xff]  ;;  %v1162_v13 = vld [vmem:[#allocation7 + $0x18] sm:$0xff]  ;;  %v1160_v17 = vld [vmem:[#allocation7 + $0x8] sm:$0xff] }
  0x29   :  { %633 = vmatpush.bf16.msra.mxu2 %v1112_v27  ;;  %v1159_v21 = vld [vmem:[#allocation7] sm:$0xff]  ;;  %v1173_v23 = vld [vmem:[%s1333_s2] ss:$0 sm:$0xff] }
  0x2a   :  { %646 = vmatpush.bf16.msra.mxu3 %v1120_v28 }
  0x2b   :  { %608 = vmatpush.bf16.msra.mxu0 %v1095_v29 }
  0x2c   :  { %621 = vmatpush.bf16.msra.mxu1 %v1103_v30 }
  0x2d   :  { %634 = vmatpush.bf16.msra.mxu2 %v1111_v31 }
  0x2e   :  { %647 = vmatpush.bf16.msra.mxu3 %v1119_v32  ;;  %609 = vmatmul.bf16.vlgmr.msra.gmra.mxu0 %v201_v39 }
  0x2f   :  { %653 = vmatpush.bf16.msrb.mxu0 %v1134_v33  ;;  %622 = vmatmul.bf16.vlgmr.msra.gmra.mxu1 %v202_v42 }
  0x30   :  { %666 = vmatpush.bf16.msrb.mxu1 %v1142_v34  ;;  %635 = vmatmul.bf16.vlgmr.msra.gmra.mxu2 %v203_v38 }
  0x31   :  { %679 = vmatpush.bf16.msrb.mxu2 %v1150_v35  ;;  %648 = vmatmul.bf16.vlgmr.msra.gmra.mxu3 %v204_v41 }
  0x32   :  { %692 = vmatpush.bf16.msrb.mxu3 %v1158_v36 }
  0x33   :  { %654 = vmatpush.bf16.msrb.mxu0 %v1133_v37 }
  0x34   :  { %667 = vmatpush.bf16.msrb.mxu1 %v1141_v40 }
  0x35   :  { %680 = vmatpush.bf16.msrb.mxu2 %v1149_v43 }
  0x36   :  { %693 = vmatpush.bf16.msrb.mxu3 %v1157_v44  ;;  %v1174_v44 = vld [vmem:[%s1335_s4] ss:$0 sm:$0xff] }
  0x37   :  { %655 = vmatpush.bf16.msrb.mxu0 %v1132_v45 }
  0x38   :  { %668 = vmatpush.bf16.msrb.mxu1 %v1140_v46 }
  0x39   :  { %681 = vmatpush.bf16.msrb.mxu2 %v1148_v47 }
  0x3a   :  { %694 = vmatpush.bf16.msrb.mxu3 %v1156_v48 }
  0x3b   :  { %656 = vmatpush.bf16.msrb.mxu0 %v1131_v49 }
  0x3c   :  { %669 = vmatpush.bf16.msrb.mxu1 %v1139_v50 }
  0x3d   :  { %682 = vmatpush.bf16.msrb.mxu2 %v1147_v51 }
  0x3e   :  { %695 = vmatpush.bf16.msrb.mxu3 %v1155_v52 }
  0x3f   :  { %657 = vmatpush.bf16.msrb.mxu0 %v1130_v53 }
  0x40   :  { %670 = vmatpush.bf16.msrb.mxu1 %v1138_v54 }
  0x41   :  { %683 = vmatpush.bf16.msrb.mxu2 %v1146_v55 }
  0x42   :  { %696 = vmatpush.bf16.msrb.mxu3 %v1154_v56 }
  0x43   :  { %658 = vmatpush.bf16.msrb.mxu0 %v1129_v57 }
  0x44   :  { %671 = vmatpush.bf16.msrb.mxu1 %v1137_v58 }
  0x45   :  { %684 = vmatpush.bf16.msrb.mxu2 %v1145_v59 }
  0x46   :  { %697 = vmatpush.bf16.msrb.mxu3 %v1153_v60 }
  0x47   :  { %659 = vmatpush.bf16.msrb.mxu0 %v1128_v61 }
  0x48   :  { %672 = vmatpush.bf16.msrb.mxu1 %v1136_v62 }
  0x49   :  { %685 = vmatpush.bf16.msrb.mxu2 %v1144_v63 }
  0x4a   :  { %698 = vmatpush.bf16.msrb.mxu3 %v1152_v0 }
  0x4b   :  { %660 = vmatpush.bf16.msrb.mxu0 %v1127_v1 }
  0x4c   :  { %673 = vmatpush.bf16.msrb.mxu1 %v1135_v2 }
  0x4d   :  { %686 = vmatpush.bf16.msrb.mxu2 %v1143_v3 }
  0x4e   :  { %699 = vmatpush.bf16.msrb.mxu3 %v1151_v4  ;;  %661 = vmatmul.bf16.vlgmr.msrb.gmra.mxu0 %v205_v5 }
  0x4f   :  { %674 = vmatmul.bf16.vlgmr.msrb.gmra.mxu1 %v206_v6  ;;  %775 = vmatpush.bf16.msra.mxu0 %v1166_v9 }
  0x50   :  { %687 = vmatmul.bf16.vlgmr.msrb.gmra.mxu2 %v207_v7 }
  0x51   :  { %700 = vmatmul.bf16.vlgmr.msrb.gmra.mxu3 %v208_v8 }
  0x53   :  { %776 = vmatpush.bf16.msra.mxu0 %v1165_v10 }
  0x57   :  { %777 = vmatpush.bf16.msra.mxu0 %v1164_v11 }
  0x5b   :  { %778 = vmatpush.bf16.msra.mxu0 %v1163_v12 }
  0x5f   :  { %779 = vmatpush.bf16.msra.mxu0 %v1162_v13 }
  0x63   :  { %780 = vmatpush.bf16.msra.mxu0 %v1161_v15 }
  0x67   :  { %781 = vmatpush.bf16.msra.mxu0 %v1160_v17 }
  0x6b   :  { %782 = vmatpush.bf16.msra.mxu0 %v1159_v21 }
  0xab   :  { %v610_v14 = vpop.f32.mrf.mxu0 }
  0xac   :  { %v623_v16 = vpop.f32.mrf.mxu1  ;;  %v611_v26 = vadd.f32 %v1173_v23, %v610_v14 }
  0xae   :  { %v624_v27 = vadd.f32 %v623_v16, %v611_v26 }
  0xb3   :  { %v636_v18 = vpop.f32.mrf.mxu2  ;;  %v612_v20 = vpop.f32.mrf.mxu0 }
  0xb4   :  { %v649_v19 = vpop.f32.mrf.mxu3  ;;  %v625_v22 = vpop.f32.mrf.mxu1  ;;  %v637_v28 = vadd.f32 %v636_v18, %v624_v27 }
  0xb6   :  { %v650_v29 = vadd.f32 %v649_v19, %v637_v28 }
  0xbb   :  { %v638_v24 = vpop.f32.mrf.mxu2 }
  0xbc   :  { %v651_v25 = vpop.f32.mrf.mxu3 }
  0xcb   :  { %v662_v30 = vpop.f32.mrf.mxu0 }
  0xcc   :  { %v675_v31 = vpop.f32.mrf.mxu1  ;;  %v663_v32 = vadd.f32 %v662_v30, %v650_v29 }
  0xce   :  { %v676_v33 = vadd.f32 %v675_v31, %v663_v32 }
  0xd3   :  { %v688_v34 = vpop.f32.mrf.mxu2  ;;  %v664_v37 = vpop.f32.mrf.mxu0 }
  0xd4   :  { %v701_v35 = vpop.f32.mrf.mxu3  ;;  %v689_v36 = vadd.f32 %v688_v34, %v676_v33  ;;  %v677_v38 = vpop.f32.mrf.mxu1 }
  0xd6   :  { %v702_v39 = vadd.f32 %v701_v35, %v689_v36 }
  0xd8   :  { %v705_v40 = vmax.f32 %v702_v39, 0.0 }
  0xda   :  { %v706_v41 = vpack.c.bf16 %v705_v40, %v705_v40 }
  0xdb   :  { %v690_v42 = vpop.f32.mrf.mxu2 }
  0xdc   :  { %v703_v43 = vpop.f32.mrf.mxu3  ;;  %783 = vmatmul.bf16.vlgmr.msra.gmra.mxu0 %v706_v41 }
 0x159   :  { %v784_v45 = vpop.f32.mrf.mxu0 }
 0x15a   :  { %v785_v46 = vadd.f32 %v1174_v44, %v784_v45 }
 0x15c   :  { %788 = vst [vmem:[#allocation8] sm:$0x3] %v785_v46 }
 0x15d   :  { %799 = dma.vmem_to_hbm [thread:$0]  %s795_s11, 32, %s797_s14, [#allocation4]  }
 0x161   :  { %v786_v47 = vpop.f32.mrf.mxu0 }
 0x162   :  { %1275 = dma.done.wait [#allocation4], 32  }
 0x163   :  { %1276 = vsyncadd [#allocation4], 4294967264 }
 0x164   :  { %804 = vsyncpa [#allocation3], 1 }
 0x165   :  { %805 = vsyncpa [#allocation6], 1 }
 0x166   :  { %806 = vsyncpa [#allocation4], 1 }

</bundles_post_ra>
